<compile_context>
chip_gen: v5e
topology: v5e:2x2
jax: 0.10.0
libtpu: 0.0.40
codegen_flags: <defaults>
</compile_context>

<pallas_src>
import functools

import jax
import jax.numpy as jnp
from jax.experimental import pallas as pl
from jax.experimental.pallas import tpu as pltpu

HIDDEN = 100        # PyTorch layer1/layer2 width
HIDDEN_PAD = 128    # lane-padded width used inside the kernel
LANE = 128


def _round_up(n, m):
    return ((n + m - 1) // m) * m


def _cdiv(a, b):
    return (a + b - 1) // b


def _ffnet_distance_kernel(x_ref, w1_ref, b1_ref, w2_ref, b2_ref, w3_ref,
                           eps_ref, out_ref):
    # x_ref : [2, TILE_B, F] bf16   (view 0 / view 1 stacked on leading axis)
    # w1    : [F, 128]  bf16     b1 : [1, 128] f32
    # w2    : [128,128] bf16     b2 : [1, 128] f32   (BN1 affine folded in)
    # w3    : [128,128] bf16                         (BN2 scale folded in)
    # eps   : [1, 128]  f32   (1e-6 on real embedding lanes, 0 on pad lanes)
    # out   : [1, TILE_B] f32
    two, tile_b, f = x_ref.shape

    # Merge the two views along M: one long matmul stream for layer1/layer2.
    # (Collapsing the leading dim into the sublane dim is layout-free since
    # tile_b is a multiple of 8.)
    x = x_ref[...].reshape(two * tile_b, f)

    # layer1: Linear + ReLU (bf16 MXU operands, f32 accumulate / elementwise).
    h = jnp.dot(x, w1_ref[...], preferred_element_type=jnp.float32)
    h = jnp.maximum(h + b1_ref[...], 0.0)
    # layer2: Linear + ReLU (BN1 affine already folded into w2/b2).
    h = jnp.dot(h.astype(jnp.bfloat16), w2_ref[...],
                preferred_element_type=jnp.float32)
    h = jnp.maximum(h + b2_ref[...], 0.0)

    # layer3 is linear, so apply it once to the *difference* of the two view
    # halves (layer3 bias and the folded BN2 shift cancel in the subtraction).
    d = h[tile_b:, :] - h[:tile_b, :]                     # [TILE_B, 128] f32
    diff = jnp.dot(d.astype(jnp.bfloat16), w3_ref[...],
                   preferred_element_type=jnp.float32) + eps_ref[...]
    # PairwiseDistance(p=1): L1 over embedding lanes (padded lanes are 0).
    out_ref[...] = jnp.sum(jnp.abs(diff), axis=-1)[None, :]   # [1, TILE_B]


def make_raw_params(key, num_feats, dim_size=10):
    """PyTorch-equivalent parameters (Linear as (in,out) + eval-mode BN stats)."""
    ks = jax.random.split(key, 14)

    def linear(kw, kb, fan_in, fan_out):
        bound = 1.0 / jnp.sqrt(jnp.asarray(fan_in, jnp.float32))
        w = jax.random.uniform(kw, (fan_in, fan_out), jnp.float32, -bound, bound)
        b = jax.random.uniform(kb, (1, fan_out), jnp.float32, -bound, bound)
        return w, b

    w1, b1 = linear(ks[0], ks[1], num_feats, HIDDEN)
    w2, b2 = linear(ks[2], ks[3], HIDDEN, HIDDEN)
    w3, b3 = linear(ks[4], ks[5], HIDDEN, dim_size)

    # Non-trivial eval-mode BN params / running stats so the folding path is
    # actually exercised by the correctness check.
    def bn(kg, kb_, km, kv, chan):
        gamma = 1.0 + 0.1 * jax.random.normal(kg, (1, chan), jnp.float32)
        beta = 0.1 * jax.random.normal(kb_, (1, chan), jnp.float32)
        mean = 0.1 * jax.random.normal(km, (1, chan), jnp.float32)
        var = jax.random.uniform(kv, (1, chan), jnp.float32, 0.5, 1.5)
        return gamma, beta, mean, var

    g1, be1, m1, v1 = bn(ks[6], ks[7], ks[8], ks[9], HIDDEN)
    g2, be2, m2, v2 = bn(ks[10], ks[11], ks[12], ks[13], HIDDEN)

    return dict(w1=w1, b1=b1, w2=w2, b2=b2, w3=w3, b3=b3,
                g1=g1, be1=be1, m1=m1, v1=v1,
                g2=g2, be2=be2, m2=m2, v2=v2)


def fold_and_pad_params(raw, dim_size):
    """Fold eval-BN affines into the following Linear, lane-pad to 128, and
    cast the MXU operands (weights) to bf16."""
    bn_eps = 1e-5

    def scale_shift(g, be, m, v):
        s = g / jnp.sqrt(v + bn_eps)
        return s, be - m * s

    s1, t1 = scale_shift(raw["g1"], raw["be1"], raw["m1"], raw["v1"])
    s2, _t2 = scale_shift(raw["g2"], raw["be2"], raw["m2"], raw["v2"])

    w1 = raw["w1"]                               # (F, 100)
    b1 = raw["b1"]                               # (1, 100)
    # BN1 affine folded into layer2's Linear:   (h*s1 + t1)@W2 + b2
    w2 = raw["w2"] * s1[0][:, None]              # (100, 100)
    b2 = t1 @ raw["w2"] + raw["b2"]              # (1, 100)
    # BN2 scale folded into layer3's Linear; its shift (and b3) cancel in the
    # distance difference, so only the scale is kept.
    w3 = raw["w3"] * s2[0][:, None]              # (100, dim)

    dim_pad = _round_up(dim_size, LANE)

    def pad2d(a, rows, cols):
        return jnp.pad(a, ((0, rows - a.shape[0]), (0, cols - a.shape[1])))

    f = w1.shape[0]
    w1p = pad2d(w1, f, HIDDEN_PAD).astype(jnp.bfloat16)
    b1p = pad2d(b1, 1, HIDDEN_PAD)                               # f32
    w2p = pad2d(w2, HIDDEN_PAD, HIDDEN_PAD).astype(jnp.bfloat16)
    b2p = pad2d(b2, 1, HIDDEN_PAD)                               # f32
    w3p = pad2d(w3, HIDDEN_PAD, dim_pad).astype(jnp.bfloat16)
    # PairwiseDistance eps only on the real embedding lanes (padded lanes must
    # not contribute |1e-6| each to the L1 sum).  Kept in f32.
    eps_vec = jnp.where(jnp.arange(dim_pad)[None, :] < dim_size, 1e-6, 0.0)
    eps_vec = eps_vec.astype(jnp.float32)

    return dict(w1=w1p, b1=b1p, w2=w2p, b2=b2p, w3=w3p, eps=eps_vec)


def _choose_tile(batch, max_tile):
    """128-aligned batch tile: padding waste < 128 rows, >= 2 grid steps when
    there is enough work (v7x megacore), tile_b <= max_tile."""
    max_tile = _round_up(max_tile, LANE)
    b_lane = _round_up(batch, LANE)
    min_steps = 2 if b_lane >= 2 * LANE else 1
    n_steps = max(min_steps, _cdiv(b_lane, max_tile))
    tile_b = _round_up(_cdiv(b_lane, n_steps), LANE)
    b_pad = _round_up(b_lane, tile_b)
    return tile_b, b_pad


@functools.partial(jax.jit, static_argnames=("max_tile",))
def ffnet_distance(x, params, *, max_tile=2048):
    """x: [B, 2, num_feats] float32, params from fold_and_pad_params -> [B]."""
    B, _, F = x.shape
    H = params["w2"].shape[0]      # 128
    D = params["w3"].shape[1]      # 128

    tile_b, b_pad = _choose_tile(B, max_tile)

    # Single fused transpose+cast: [B,2,F] f32 -> [2,B_pad,F] bf16. No
    # per-view strided slice copies; kernel-side DMA bytes are halved.
    xt = jnp.transpose(x.astype(jnp.bfloat16), (1, 0, 2))
    if b_pad != B:
        xt = jnp.pad(xt, ((0, 0), (0, b_pad - B), (0, 0)))

    grid = (b_pad // tile_b,)

    def pinned(shape):
        return pl.BlockSpec(shape, lambda i: (0, 0))

    flops = b_pad * (4 * F * H + 4 * H * H + 2 * H * D)
    bytes_accessed = (2 * b_pad * F) * 2 + b_pad * 4 + sum(
        int(v.size) * v.dtype.itemsize for v in params.values())

    out = pl.pallas_call(
        _ffnet_distance_kernel,
        out_shape=jax.ShapeDtypeStruct((1, b_pad), jnp.float32),
        grid=grid,
        in_specs=[
            pl.BlockSpec((2, tile_b, F), lambda i: (0, i, 0)),  # both views
            pinned((F, H)),           # w1 (bf16)
            pinned((1, H)),           # b1 (f32)
            pinned((H, H)),           # w2 (BN1 folded, bf16)
            pinned((1, H)),           # b2 (BN1 folded, f32)
            pinned((H, D)),           # w3 (BN2 scale folded, bf16)
            pinned((1, D)),           # eps vector (f32)
        ],
        out_specs=pl.BlockSpec((1, tile_b), lambda i: (0, i)),
        compiler_params=pltpu.CompilerParams(
            dimension_semantics=("parallel",)),
        cost_estimate=pl.CostEstimate(
            flops=flops, transcendentals=0, bytes_accessed=bytes_accessed),
    )(xt, params["w1"], params["b1"], params["w2"], params["b2"],
      params["w3"], params["eps"])

    return out[0, :B]


def _reference(x, raw):
    """Pure-JAX f32 reference using the *unfolded* PyTorch-equivalent params."""
    bn_eps = 1e-5

    def bn(h, g, be, m, v):
        return (h - m) / jnp.sqrt(v + bn_eps) * g + be

    def mlp(v):
        h = jnp.maximum(v @ raw["w1"] + raw["b1"], 0.0)
        h = bn(h, raw["g1"], raw["be1"], raw["m1"], raw["v1"])
        h = jnp.maximum(h @ raw["w2"] + raw["b2"], 0.0)
        h = bn(h, raw["g2"], raw["be2"], raw["m2"], raw["v2"])
        return h @ raw["w3"] + raw["b3"]

    out0 = mlp(x[:, 0, :])
    out1 = mlp(x[:, 1, :])
    return jnp.sum(jnp.abs(out1 - out0 + 1e-6), axis=-1)


if __name__ == "__main__":
    key = jax.random.PRNGKey(0)
    k_x, k_p, k_x2 = jax.random.split(key, 3)

    num_feats, dim_size = 32, 10
    raw = make_raw_params(k_p, num_feats, dim_size)
    params = fold_and_pad_params(raw, dim_size)

    # Tolerances are relaxed vs. the f32-only version because MXU operands
    # are bf16 (f32 accumulation); eps/abs/sum stay f32.
    RTOL, ATOL = 5e-2, 1e-2

    # Small shape consistent with the module.
    B = 8
    x = jax.random.normal(k_x, (B, 2, num_feats), jnp.float32)
    dist = ffnet_distance(x, params)
    jax.block_until_ready(dist)
    ref = _reference(x, raw)
    assert dist.shape == (B,)
    assert jnp.allclose(dist, ref, rtol=RTOL, atol=ATOL), (dist, ref)

    # A second check that exercises the multi-step batch grid + row padding.
    B2 = 300
    x2 = jax.random.normal(k_x2, (B2, 2, num_feats), jnp.float32)
    dist2 = ffnet_distance(x2, params, max_tile=128)   # grid = (3,)
    jax.block_until_ready(dist2)
    ref2 = _reference(x2, raw)
    assert dist2.shape == (B2,)
    assert jnp.allclose(dist2, ref2, rtol=RTOL, atol=ATOL)

    print("KERNEL_OK")
</pallas_src>

<mosaic_0001>
module attributes {stable_mosaic.version = 11 : i64} {
  func.func @_ffnet_distance_kernel(%arg0: i32, %arg1: memref<2x128x32xbf16, #tpu.memory_space<vmem>>, %arg2: memref<32x128xbf16, #tpu.memory_space<vmem>>, %arg3: memref<1x128xf32, #tpu.memory_space<vmem>>, %arg4: memref<128x128xbf16, #tpu.memory_space<vmem>>, %arg5: memref<1x128xf32, #tpu.memory_space<vmem>>, %arg6: memref<128x128xbf16, #tpu.memory_space<vmem>>, %arg7: memref<1x128xf32, #tpu.memory_space<vmem>>, %arg8: memref<1x128xf32, #tpu.memory_space<vmem>>) attributes {dimension_semantics = [#tpu.dimension_semantics<parallel>], iteration_bounds = array<i64: 1>, scalar_prefetch = 0 : i64, scratch_operands = 0 : i64, tpu.core_type = #tpu.core_type<tc>, window_params = [{transform_indices = @transform_0, window_bounds = array<i64: 2, 128, 32>}, {pipeline_mode = #tpu.pipeline_mode<synchronous>, transform_indices = @transform_1, window_bounds = array<i64: 32, 128>}, {pipeline_mode = #tpu.pipeline_mode<synchronous>, transform_indices = @transform_2, window_bounds = array<i64: 1, 128>}, {pipeline_mode = #tpu.pipeline_mode<synchronous>, transform_indices = @transform_3, window_bounds = array<i64: 128, 128>}, {pipeline_mode = #tpu.pipeline_mode<synchronous>, transform_indices = @transform_4, window_bounds = array<i64: 1, 128>}, {pipeline_mode = #tpu.pipeline_mode<synchronous>, transform_indices = @transform_5, window_bounds = array<i64: 128, 128>}, {pipeline_mode = #tpu.pipeline_mode<synchronous>, transform_indices = @transform_6, window_bounds = array<i64: 1, 128>}, {transform_indices = @transform_7, window_bounds = array<i64: 1, 128>}]} {
    %c0 = arith.constant 0 : index
    %c0_0 = arith.constant 0 : index
    %c0_1 = arith.constant 0 : index
    %0 = vector.load %arg1[%c0, %c0_0, %c0_1] : memref<2x128x32xbf16, #tpu.memory_space<vmem>>, vector<2x128x32xbf16>
    %1 = vector.shape_cast %0 : vector<2x128x32xbf16> to vector<256x32xbf16>
    %c0_2 = arith.constant 0 : index
    %c0_3 = arith.constant 0 : index
    %2 = vector.load %arg2[%c0_2, %c0_3] : memref<32x128xbf16, #tpu.memory_space<vmem>>, vector<32x128xbf16>
    %cst = arith.constant dense<0.000000e+00> : vector<256x128xf32>
    %3 = tpu.matmul %1, %2, %cst {dimension_numbers = #tpu.dot_dimension_numbers<[1], [0], [0], [1], [0, 0, 1, 1], [], []>} : vector<256x32xbf16>, vector<32x128xbf16>, vector<256x128xf32> -> vector<256x128xf32>
    %c0_4 = arith.constant 0 : index
    %c0_5 = arith.constant 0 : index
    %4 = vector.load %arg3[%c0_4, %c0_5] : memref<1x128xf32, #tpu.memory_space<vmem>>, vector<1x128xf32>
    %5 = vector.broadcast %4 : vector<1x128xf32> to vector<256x128xf32>
    %6 = arith.addf %3, %5 : vector<256x128xf32>
    %cst_6 = arith.constant 0.000000e+00 : f32
    %7 = vector.broadcast %cst_6 : f32 to vector<256x128xf32>
    %8 = arith.maximumf %6, %7 : vector<256x128xf32>
    %9 = arith.truncf %8 : vector<256x128xf32> to vector<256x128xbf16>
    %c0_7 = arith.constant 0 : index
    %c0_8 = arith.constant 0 : index
    %10 = vector.load %arg4[%c0_7, %c0_8] : memref<128x128xbf16, #tpu.memory_space<vmem>>, vector<128x128xbf16>
    %cst_9 = arith.constant dense<0.000000e+00> : vector<256x128xf32>
    %11 = tpu.matmul %9, %10, %cst_9 {dimension_numbers = #tpu.dot_dimension_numbers<[1], [0], [0], [1], [0, 0, 1, 1], [], []>} : vector<256x128xbf16>, vector<128x128xbf16>, vector<256x128xf32> -> vector<256x128xf32>
    %c0_10 = arith.constant 0 : index
    %c0_11 = arith.constant 0 : index
    %12 = vector.load %arg5[%c0_10, %c0_11] : memref<1x128xf32, #tpu.memory_space<vmem>>, vector<1x128xf32>
    %13 = vector.broadcast %12 : vector<1x128xf32> to vector<256x128xf32>
    %14 = arith.addf %11, %13 : vector<256x128xf32>
    %cst_12 = arith.constant 0.000000e+00 : f32
    %15 = vector.broadcast %cst_12 : f32 to vector<256x128xf32>
    %16 = arith.maximumf %14, %15 : vector<256x128xf32>
    %17 = vector.extract_strided_slice %16 {offsets = [128, 0], sizes = [128, 128], strides = [1, 1]} : vector<256x128xf32> to vector<128x128xf32>
    %18 = vector.extract_strided_slice %16 {offsets = [0, 0], sizes = [128, 128], strides = [1, 1]} : vector<256x128xf32> to vector<128x128xf32>
    %19 = arith.subf %17, %18 : vector<128x128xf32>
    %20 = arith.truncf %19 : vector<128x128xf32> to vector<128x128xbf16>
    %c0_13 = arith.constant 0 : index
    %c0_14 = arith.constant 0 : index
    %21 = vector.load %arg6[%c0_13, %c0_14] : memref<128x128xbf16, #tpu.memory_space<vmem>>, vector<128x128xbf16>
    %cst_15 = arith.constant dense<0.000000e+00> : vector<128x128xf32>
    %22 = tpu.matmul %20, %21, %cst_15 {dimension_numbers = #tpu.dot_dimension_numbers<[1], [0], [0], [1], [0, 0, 1, 1], [], []>} : vector<128x128xbf16>, vector<128x128xbf16>, vector<128x128xf32> -> vector<128x128xf32>
    %c0_16 = arith.constant 0 : index
    %c0_17 = arith.constant 0 : index
    %23 = vector.load %arg7[%c0_16, %c0_17] : memref<1x128xf32, #tpu.memory_space<vmem>>, vector<1x128xf32>
    %24 = vector.broadcast %23 : vector<1x128xf32> to vector<128x128xf32>
    %25 = arith.addf %22, %24 : vector<128x128xf32>
    %26 = math.absf %25 : vector<128x128xf32>
    %cst_18 = arith.constant dense<0.000000e+00> : vector<128xf32>
    %27 = vector.multi_reduction <add>, %26, %cst_18 [1] : vector<128x128xf32> to vector<128xf32>
    %28 = vector.shape_cast %27 : vector<128xf32> to vector<1x128xf32>
    %c0_19 = arith.constant 0 : index
    %c0_20 = arith.constant 0 : index
    %29 = vector.load %arg8[%c0_19, %c0_20] : memref<1x128xf32, #tpu.memory_space<vmem>>, vector<1x128xf32>
    tpu.vector_store %arg8[%c0_19, %c0_20], %28 {strides = array<i32>} : memref<1x128xf32, #tpu.memory_space<vmem>>, vector<1x128xf32>,
    return
  }
  func.func @transform_0(%arg0: i32) -> (i32, i32, i32) {
    %c0_i32 = arith.constant 0 : i32
    %c0_i32_0 = arith.constant 0 : i32
    %c0_i32_1 = arith.constant 0 : i32
    return %c0_i32, %arg0, %c0_i32_0 : i32, i32, i32
  }
  func.func @transform_1(%arg0: i32) -> (i32, i32) {
    %c0_i32 = arith.constant 0 : i32
    %c0_i32_0 = arith.constant 0 : i32
    %c0_i32_1 = arith.constant 0 : i32
    return %c0_i32, %c0_i32_0 : i32, i32
  }
  func.func @transform_2(%arg0: i32) -> (i32, i32) {
    %c0_i32 = arith.constant 0 : i32
    %c0_i32_0 = arith.constant 0 : i32
    %c0_i32_1 = arith.constant 0 : i32
    return %c0_i32, %c0_i32_0 : i32, i32
  }
  func.func @transform_3(%arg0: i32) -> (i32, i32) {
    %c0_i32 = arith.constant 0 : i32
    %c0_i32_0 = arith.constant 0 : i32
    %c0_i32_1 = arith.constant 0 : i32
    return %c0_i32, %c0_i32_0 : i32, i32
  }
  func.func @transform_4(%arg0: i32) -> (i32, i32) {
    %c0_i32 = arith.constant 0 : i32
    %c0_i32_0 = arith.constant 0 : i32
    %c0_i32_1 = arith.constant 0 : i32
    return %c0_i32, %c0_i32_0 : i32, i32
  }
  func.func @transform_5(%arg0: i32) -> (i32, i32) {
    %c0_i32 = arith.constant 0 : i32
    %c0_i32_0 = arith.constant 0 : i32
    %c0_i32_1 = arith.constant 0 : i32
    return %c0_i32, %c0_i32_0 : i32, i32
  }
  func.func @transform_6(%arg0: i32) -> (i32, i32) {
    %c0_i32 = arith.constant 0 : i32
    %c0_i32_0 = arith.constant 0 : i32
    %c0_i32_1 = arith.constant 0 : i32
    return %c0_i32, %c0_i32_0 : i32, i32
  }
  func.func @transform_7(%arg0: i32) -> (i32, i32) {
    %c0_i32 = arith.constant 0 : i32
    %c0_i32_0 = arith.constant 0 : i32
    return %c0_i32, %arg0 : i32, i32
  }
}

</mosaic_0001>

<bundles_post_ra>
// kernel: ffnet_distance.1
= control target key start
LH: loop header
LB: loop body
LE: loop exit
PB: predicated region body
PF: predicated region fallthrough
CT: control target
= control target key end

     0   :  { %vm159_vm0 = vcmask 261120   ;;  %vm744_vm1 = vcmask 130112   ;;  %vm748_vm2 = vcmask 195712   ;;  %vm752_vm3 = vcmask 261312   ;;  %s1293_s1 = inlined_call_operand.vmem [shape: bf16[32,128], index: 1, kind: input, shape index: {}]   ;;  %s1294_s2 = inlined_call_operand.vmem [shape: f32[1,128], index: 2, kind: input, shape index: {}]   ;;  %s1295_s0 = inlined_call_operand.vmem [shape: bf16[2,128,32], index: 0, kind: input, shape index: {}]   ;;  %s1296_s3 = inlined_call_operand.vmem [shape: bf16[128,128], index: 3, kind: input, shape index: {}]   ;;  %s1297_s4 = inlined_call_operand.vmem [shape: f32[1,128], index: 4, kind: input, shape index: {}]   ;;  %s1298_s5 = inlined_call_operand.vmem [shape: bf16[128,128], index: 5, kind: input, shape index: {}]   ;;  %s1299_s6 = inlined_call_operand.vmem [shape: f32[1,128], index: 6, kind: input, shape index: {}]   ;;  %s1300_s7 = inlined_call_operand.vmem [shape: f32[1,128], index: 7, kind: output, shape index: {}]  }
   0x1   :  { %v977_v0 = vld [vmem:[%s1293_s1 + $0x8] sm:$0xff]  ;;  %v976_v1 = vld [vmem:[%s1293_s1] sm:$0xff]  ;;  %v962_v4 = vld [vmem:[%s1295_s0 + $0x10] sm:$0xff]  ;;  %vm756_vm4 = vcmask 326912   ;;  %vm760_vm5 = vcmask 392512   ;;  %vm764_vm6 = vcmask 458112  }
   0x2   :  { %214 = vmatpush.bf16.msra.mxu0 %v977_v0  ;;  %994 = vmatpush.bf16.msra.mxu3 %v977_v0  ;;  %v960_v2 = vld [vmem:[%s1295_s0] sm:$0xff]  ;;  %v961_v3 = vld [vmem:[%s1295_s0 + $0x8] sm:$0xff]  ;;  %v963_v5 = vld [vmem:[%s1295_s0 + $0x18] sm:$0xff]  ;;  %vm768_vm7 = vcmask 523712   ;;  %vm772_vm8 = vcmask 589312   ;;  %vm776_vm9 = vcmask 654912  }
   0x3   :  { %v964_v6 = vld [vmem:[%s1295_s0 + $0x20] sm:$0xff]  ;;  %v985_v7 = vld [vmem:[%s1296_s3 + $0x38] sm:$0xff]  ;;  %v965_v8 = vld [vmem:[%s1295_s0 + $0x28] sm:$0xff]  ;;  %vm780_vm10 = vcmask 720512   ;;  %vm784_vm11 = vcmask 786112   ;;  %vm788_vm12 = vcmask 851712  }
   0x4   :  { %413 = vmatpush.bf16.msra.mxu1 %v985_v7  ;;  %v984_v9 = vld [vmem:[%s1296_s3 + $0x30] sm:$0xff]  ;;  %v983_v10 = vld [vmem:[%s1296_s3 + $0x28] sm:$0xff]  ;;  %v982_v11 = vld [vmem:[%s1296_s3 + $0x20] sm:$0xff]  ;;  %vm792_vm13 = vcmask 917312   ;;  %vm796_vm14 = vcmask 982912   ;;  %vm800_vm15 = vcmask 1048512  }
   0x5   :  { %v981_v12 = vld [vmem:[%s1296_s3 + $0x18] sm:$0xff]  ;;  %v966_v13 = vld [vmem:[%s1295_s0 + $0x30] sm:$0xff]  ;;  %v979_v15 = vld [vmem:[%s1296_s3 + $0x8] sm:$0xff] }
   0x6   :  { %215 = vmatpush.bf16.msra.mxu0 %v976_v1  ;;  %995 = vmatpush.bf16.msra.mxu3 %v976_v1  ;;  %v980_v14 = vld [vmem:[%s1296_s3 + $0x10] sm:$0xff]  ;;  %v978_v16 = vld [vmem:[%s1296_s3] sm:$0xff]  ;;  %v967_v17 = vld [vmem:[%s1295_s0 + $0x38] sm:$0xff] }
   0x7   :  { %v968_v18 = vld [vmem:[%s1295_s0 + $0x40] sm:$0xff]  ;;  %v971_v21 = vld [vmem:[%s1295_s0 + $0x58] sm:$0xff]  ;;  %v969_v28 = vld [vmem:[%s1295_s0 + $0x48] sm:$0xff] }
   0x8   :  { %414 = vmatpush.bf16.msra.mxu1 %v984_v9  ;;  %v1115_v20 = vld [vmem:[%s1294_s2] ss:$0 sm:$0xff]  ;;  %v970_v37 = vld [vmem:[%s1295_s0 + $0x50] sm:$0xff]  ;;  %v973_v39 = vld [vmem:[%s1295_s0 + $0x68] sm:$0xff] }
   0x9   :  { %880 = vmatmul.msk.bf16.vlgmr.msra.gmra.mxu0 %vm159_vm0, %v960_v2  ;;  %891 = vmatmul.msk.bf16.vlgmr.msra.gmra.mxu3 %vm159_vm0, %v971_v21  ;;  %v972_v30 = vld [vmem:[%s1295_s0 + $0x60] sm:$0xff]  ;;  %v974_v47 = vld [vmem:[%s1295_s0 + $0x70] sm:$0xff]  ;;  %v975_v55 = vld [vmem:[%s1295_s0 + $0x78] sm:$0xff] }
   0xa   :  { %996 = vmatpush.bf16.msrb.mxu3 %v985_v7 }
   0xc   :  { %415 = vmatpush.bf16.msra.mxu1 %v983_v10 }
   0xe   :  { %997 = vmatpush.bf16.msrb.mxu3 %v984_v9 }
  0x10   :  { %416 = vmatpush.bf16.msra.mxu1 %v982_v11 }
  0x12   :  { %998 = vmatpush.bf16.msrb.mxu3 %v983_v10 }
  0x14   :  { %417 = vmatpush.bf16.msra.mxu1 %v981_v12 }
  0x16   :  { %999 = vmatpush.bf16.msrb.mxu3 %v982_v11 }
  0x18   :  { %418 = vmatpush.bf16.msra.mxu1 %v980_v14 }
  0x19   :  { %881 = vmatmul.msk.bf16.gmra.mxu0 %vm159_vm0, %v961_v3  ;;  %892 = vmatmul.msk.bf16.gmra.mxu3 %vm159_vm0, %v972_v30 }
  0x1a   :  { %1000 = vmatpush.bf16.msrb.mxu3 %v981_v12 }
  0x1c   :  { %419 = vmatpush.bf16.msra.mxu1 %v979_v15 }
  0x1e   :  { %1001 = vmatpush.bf16.msrb.mxu3 %v980_v14 }
  0x20   :  { %420 = vmatpush.bf16.msra.mxu1 %v978_v16 }
  0x22   :  { %1002 = vmatpush.bf16.msrb.mxu3 %v979_v15 }
  0x26   :  { %1003 = vmatpush.bf16.msrb.mxu3 %v978_v16 }
  0x29   :  { %882 = vmatmul.msk.bf16.gmra.mxu0 %vm159_vm0, %v962_v4  ;;  %893 = vmatmul.msk.bf16.gmra.mxu3 %vm159_vm0, %v973_v39 }
  0x39   :  { %883 = vmatmul.msk.bf16.gmra.mxu0 %vm159_vm0, %v963_v5  ;;  %894 = vmatmul.msk.bf16.gmra.mxu3 %vm159_vm0, %v974_v47 }
  0x49   :  { %884 = vmatmul.msk.bf16.gmra.mxu0 %vm159_vm0, %v964_v6  ;;  %895 = vmatmul.msk.bf16.gmra.mxu3 %vm159_vm0, %v975_v55 }
  0x59   :  { %885 = vmatmul.msk.bf16.gmra.mxu0 %vm159_vm0, %v965_v8 }
  0x69   :  { %886 = vmatmul.msk.bf16.gmra.mxu0 %vm159_vm0, %v966_v13 }
  0x79   :  { %887 = vmatmul.msk.bf16.gmra.mxu0 %vm159_vm0, %v967_v17 }
  0x86   :  { %v217_v19 = vpop.f32.mrf.mxu0 }
  0x87   :  { %v218_v22 = vadd.f32 %v1115_v20, %v217_v19 }
  0x89   :  { %888 = vmatmul.msk.bf16.gmra.mxu0 %vm159_vm0, %v968_v18  ;;  %v297_v25 = vmax.f32 %v218_v22, 0.0 }
  0x8e   :  { %v219_v23 = vpop.f32.mrf.mxu0 }
  0x8f   :  { %v220_v24 = vadd.f32 %v1115_v20, %v219_v23 }
  0x91   :  { %v298_v26 = vmax.f32 %v220_v24, 0.0 }
  0x93   :  { %v329_v27 = vpack.c.bf16 %v298_v26, %v297_v25 }
  0x95   :  { %421 = vmatmul.bf16.vlgmr.msra.gmra.mxu1 %v329_v27 }
  0x96   :  { %v222_v29 = vpop.f32.mrf.mxu0 }
  0x97   :  { %v223_v31 = vadd.f32 %v1115_v20, %v222_v29 }
  0x99   :  { %889 = vmatmul.msk.bf16.gmra.mxu0 %vm159_vm0, %v969_v28  ;;  %v299_v34 = vmax.f32 %v223_v31, 0.0 }
  0x9e   :  { %v224_v32 = vpop.f32.mrf.mxu0 }
  0x9f   :  { %v225_v33 = vadd.f32 %v1115_v20, %v224_v32  ;;  %v272_v32 = vpop.f32.mrf.mxu3 }
  0xa1   :  { %v300_v35 = vmax.f32 %v225_v33, 0.0 }
  0xa3   :  { %v330_v36 = vpack.c.bf16 %v300_v35, %v299_v34 }
  0xa5   :  { %426 = vmatmul.bf16.gmra.mxu1 %v330_v36 }
  0xa6   :  { %v227_v38 = vpop.f32.mrf.mxu0 }
  0xa7   :  { %v228_v40 = vadd.f32 %v1115_v20, %v227_v38  ;;  %v274_v39 = vpop.f32.mrf.mxu3 }
  0xa9   :  { %890 = vmatmul.msk.bf16.gmra.mxu0 %vm159_vm0, %v970_v37  ;;  %v301_v43 = vmax.f32 %v228_v40, 0.0 }
  0xae   :  { %v229_v41 = vpop.f32.mrf.mxu0 }
  0xaf   :  { %v230_v42 = vadd.f32 %v1115_v20, %v229_v41  ;;  %v277_v47 = vpop.f32.mrf.mxu3 }
  0xb1   :  { %v302_v44 = vmax.f32 %v230_v42, 0.0 }
  0xb3   :  { %v331_v45 = vpack.c.bf16 %v302_v44, %v301_v43 }
  0xb5   :  { %431 = vmatmul.bf16.gmra.mxu1 %v331_v45 }
  0xb6   :  { %v232_v46 = vpop.f32.mrf.mxu0 }
  0xb7   :  { %v233_v48 = vadd.f32 %v1115_v20, %v232_v46 }
  0xb9   :  { %v303_v51 = vmax.f32 %v233_v48, 0.0 }
  0xbe   :  { %v234_v49 = vpop.f32.mrf.mxu0 }
  0xbf   :  { %v235_v50 = vadd.f32 %v1115_v20, %v234_v49 }
  0xc1   :  { %v304_v52 = vmax.f32 %v235_v50, 0.0  ;;  %v273_v50 = vadd.f32 %v1115_v20, %v272_v32 }
  0xc3   :  { %v332_v53 = vpack.c.bf16 %v304_v52, %v303_v51  ;;  %v275_v51 = vadd.f32 %v1115_v20, %v274_v39  ;;  %v279_v52 = vpop.f32.mrf.mxu3 }
  0xc5   :  { %436 = vmatmul.bf16.gmra.mxu1 %v332_v53  ;;  %v319_v53 = vmax.f32 %v273_v50, 0.0 }
  0xc6   :  { %v237_v54 = vpop.f32.mrf.mxu0 }
  0xc7   :  { %v238_v56 = vadd.f32 %v1115_v20, %v237_v54  ;;  %v320_v54 = vmax.f32 %v275_v51, 0.0 }
  0xc9   :  { %v305_v59 = vmax.f32 %v238_v56, 0.0  ;;  %v340_v56 = vpack.c.bf16 %v320_v54, %v319_v53 }
  0xce   :  { %v239_v57 = vpop.f32.mrf.mxu0 }
  0xcf   :  { %v240_v58 = vadd.f32 %v1115_v20, %v239_v57  ;;  %v282_v57 = vpop.f32.mrf.mxu3 }
  0xd1   :  { %v306_v60 = vmax.f32 %v240_v58, 0.0 }
  0xd3   :  { %v333_v61 = vpack.c.bf16 %v306_v60, %v305_v59  ;;  %v278_v59 = vadd.f32 %v1115_v20, %v277_v47  ;;  %v280_v60 = vadd.f32 %v1115_v20, %v279_v52 }
  0xd5   :  { %441 = vmatmul.bf16.gmra.mxu1 %v333_v61  ;;  %v321_v61 = vmax.f32 %v278_v59, 0.0 }
  0xd6   :  { %v242_v62 = vpop.f32.mrf.mxu0 }
  0xd7   :  { %v243_v63 = vadd.f32 %v1115_v20, %v242_v62  ;;  %v322_v62 = vmax.f32 %v280_v60, 0.0 }
  0xd9   :  { %v307_v2 = vmax.f32 %v243_v63, 0.0  ;;  %v284_v63 = vpop.f32.mrf.mxu3 }
  0xde   :  { %v244_v0 = vpop.f32.mrf.mxu0 }
  0xdf   :  { %v245_v1 = vadd.f32 %v1115_v20, %v244_v0 }
  0xe1   :  { %v308_v3 = vmax.f32 %v245_v1, 0.0  ;;  %v341_v1 = vpack.c.bf16 %v322_v62, %v321_v61 }
  0xe3   :  { %v334_v4 = vpack.c.bf16 %v308_v3, %v307_v2  ;;  %v287_v3 = vpop.f32.mrf.mxu3 }
  0xe5   :  { %446 = vmatmul.bf16.gmra.mxu1 %v334_v4  ;;  %v283_v4 = vadd.f32 %v1115_v20, %v282_v57 }
  0xe6   :  { %v247_v5 = vpop.f32.mrf.mxu0 }
  0xe7   :  { %v248_v6 = vadd.f32 %v1115_v20, %v247_v5  ;;  %v285_v5 = vadd.f32 %v1115_v20, %v284_v63 }
  0xe9   :  { %v309_v9 = vmax.f32 %v248_v6, 0.0  ;;  %v323_v6 = vmax.f32 %v283_v4, 0.0 }
  0xee   :  { %v249_v7 = vpop.f32.mrf.mxu0 }
  0xef   :  { %v250_v8 = vadd.f32 %v1115_v20, %v249_v7  ;;  %v324_v7 = vmax.f32 %v285_v5, 0.0 }
  0xf1   :  { %v310_v10 = vmax.f32 %v250_v8, 0.0 }
  0xf3   :  { %v335_v11 = vpack.c.bf16 %v310_v10, %v309_v9  ;;  %v993_v9 = vld [vmem:[%s1298_s5 + $0x38] sm:$0xff]  ;;  %v342_v10 = vpack.c.bf16 %v324_v7, %v323_v6 }
  0xf4   :  { %626 = vmatpush.bf16.msra.mxu2 %v993_v9 }
  0xf5   :  { %451 = vmatmul.bf16.gmra.mxu1 %v335_v11  ;;  %v289_v11 = vpop.f32.mrf.mxu3 }
  0xf6   :  { %v252_v12 = vpop.f32.mrf.mxu0 }
  0xf7   :  { %v253_v13 = vadd.f32 %v1115_v20, %v252_v12  ;;  %v992_v12 = vld [vmem:[%s1298_s5 + $0x30] sm:$0xff] }
  0xf8   :  { %627 = vmatpush.bf16.msra.mxu2 %v992_v12 }
  0xf9   :  { %v311_v16 = vmax.f32 %v253_v13, 0.0 }
  0xfe   :  { %v254_v14 = vpop.f32.mrf.mxu0 }
  0xff   :  { %v255_v15 = vadd.f32 %v1115_v20, %v254_v14  ;;  %v991_v14 = vld [vmem:[%s1298_s5 + $0x28] sm:$0xff] }
 0x100   :  { %628 = vmatpush.bf16.msra.mxu2 %v991_v14 }
 0x101   :  { %v312_v17 = vmax.f32 %v255_v15, 0.0  ;;  %v288_v15 = vadd.f32 %v1115_v20, %v287_v3 }
 0x103   :  { %v336_v18 = vpack.c.bf16 %v312_v17, %v311_v16  ;;  %v290_v16 = vadd.f32 %v1115_v20, %v289_v11  ;;  %v990_v17 = vld [vmem:[%s1298_s5 + $0x20] sm:$0xff] }
 0x104   :  { %629 = vmatpush.bf16.msra.mxu2 %v990_v17 }
 0x105   :  { %456 = vmatmul.bf16.gmra.mxu1 %v336_v18  ;;  %v292_v18 = vpop.f32.mrf.mxu3 }
 0x106   :  { %v257_v19 = vpop.f32.mrf.mxu0 }
 0x107   :  { %v258_v21 = vadd.f32 %v1115_v20, %v257_v19  ;;  %v325_v19 = vmax.f32 %v288_v15, 0.0 }
 0x109   :  { %v313_v24 = vmax.f32 %v258_v21, 0.0  ;;  %v326_v21 = vmax.f32 %v290_v16, 0.0 }
 0x10e   :  { %v259_v22 = vpop.f32.mrf.mxu0 }
 0x10f   :  { %v260_v23 = vadd.f32 %v1115_v20, %v259_v22 }
 0x111   :  { %v314_v25 = vmax.f32 %v260_v23, 0.0  ;;  %v989_v23 = vld [vmem:[%s1298_s5 + $0x18] sm:$0xff] }
 0x112   :  { %v1164_v26 = vpop.f32.mrf.mxu1  ;;  %630 = vmatpush.bf16.msra.mxu2 %v989_v23 }
 0x113   :  { %v337_v27 = vpack.c.bf16 %v314_v25, %v313_v24  ;;  %v343_v24 = vpack.c.bf16 %v326_v21, %v325_v19  ;;  %v988_v25 = vld [vmem:[%s1298_s5 + $0x10] sm:$0xff] }
 0x115   :  { %461 = vmatmul.bf16.gmra.mxu1 %v337_v27  ;;  %v294_v27 = vpop.f32.mrf.mxu3 }
 0x116   :  { %v262_v28 = vpop.f32.mrf.mxu0  ;;  %631 = vmatpush.bf16.msra.mxu2 %v988_v25  ;;  %v295_v32 = vadd.f32 %v1115_v20, %v294_v27 }
 0x117   :  { %v263_v30 = vadd.f32 %v1115_v20, %v262_v28 }
 0x119   :  { %v315_v34 = vmax.f32 %v263_v30, 0.0  ;;  %v987_v30 = vld [vmem:[%s1298_s5 + $0x8] sm:$0xff] }
 0x11a   :  { %v1166_v29 = vpop.f32.mrf.mxu1  ;;  %632 = vmatpush.bf16.msra.mxu2 %v987_v30 }
 0x11e   :  { %v264_v31 = vpop.f32.mrf.mxu0 }
 0x11f   :  { %v265_v33 = vadd.f32 %v1115_v20, %v264_v31  ;;  %v293_v31 = vadd.f32 %v1115_v20, %v292_v18 }
 0x121   :  { %v316_v35 = vmax.f32 %v265_v33, 0.0  ;;  %v986_v33 = vld [vmem:[%s1298_s5] sm:$0xff] }
 0x122   :  { %v1170_v36 = vpop.f32.mrf.mxu1  ;;  %633 = vmatpush.bf16.msra.mxu2 %v986_v33 }
 0x123   :  { %v338_v37 = vpack.c.bf16 %v316_v35, %v315_v34  ;;  %v327_v34 = vmax.f32 %v293_v31, 0.0  ;;  %v328_v35 = vmax.f32 %v295_v32, 0.0 }
 0x125   :  { %466 = vmatmul.bf16.gmra.mxu1 %v338_v37 }
 0x126   :  { %v267_v38 = vpop.f32.mrf.mxu0 }
 0x127   :  { %v268_v41 = vadd.f32 %v1115_v20, %v267_v38  ;;  %v344_v38 = vpack.c.bf16 %v328_v35, %v327_v34 }
 0x129   :  { %v317_v44 = vmax.f32 %v268_v41, 0.0 }
 0x12a   :  { %v1172_v40 = vpop.f32.mrf.mxu1 }
 0x12e   :  { %v269_v42 = vpop.f32.mrf.mxu0 }
 0x12f   :  { %v270_v43 = vadd.f32 %v1115_v20, %v269_v42  ;;  %v1237_v42 = vld [vmem:[%s1297_s4] ss:$0 sm:$0xff] }
 0x131   :  { %v318_v45 = vmax.f32 %v270_v43, 0.0  ;;  %v423_v43 = vadd.f32 %v1237_v42, %v1164_v26  ;;  %v428_v26 = vadd.f32 %v1237_v42, %v1170_v36 }
 0x132   :  { %v1176_v46 = vpop.f32.mrf.mxu1 }
 0x133   :  { %v339_v48 = vpack.c.bf16 %v318_v45, %v317_v44  ;;  %v425_v44 = vadd.f32 %v1237_v42, %v1166_v29  ;;  %v502_v50 = vmax.f32 %v423_v43, 0.0  ;;  %v430_v29 = vadd.f32 %v1237_v42, %v1172_v40 }
 0x134   :  { %v504_v63 = vmax.f32 %v428_v26, 0.0  ;;  %v433_v36 = vadd.f32 %v1237_v42, %v1176_v46 }
 0x135   :  { %471 = vmatmul.bf16.vlgmr.msrb.gmra.mxu3 %v339_v48  ;;  %v503_v51 = vmax.f32 %v425_v44, 0.0 }
 0x136   :  { %v506_v14 = vmax.f32 %v433_v36, 0.0 }
 0x13a   :  { %v1178_v49 = vpop.f32.mrf.mxu1 }
 0x13b   :  { %v435_v40 = vadd.f32 %v1237_v42, %v1178_v49 }
 0x13d   :  { %v507_v15 = vmax.f32 %v435_v40, 0.0 }
 0x142   :  { %v1182_v55 = vpop.f32.mrf.mxu1 }
 0x143   :  { %v438_v46 = vadd.f32 %v1237_v42, %v1182_v55 }
 0x145   :  { %476 = vmatmul.bf16.gmra.mxu3 %v340_v56  ;;  %v508_v30 = vmax.f32 %v438_v46, 0.0 }
 0x14a   :  { %v1184_v58 = vpop.f32.mrf.mxu1 }
 0x14b   :  { %v440_v49 = vadd.f32 %v1237_v42, %v1184_v58 }
 0x14d   :  { %v509_v31 = vmax.f32 %v440_v49, 0.0 }
 0x152   :  { %v1188_v0 = vpop.f32.mrf.mxu1 }
 0x153   :  { %v443_v55 = vadd.f32 %v1237_v42, %v1188_v0 }
 0x155   :  { %481 = vmatmul.bf16.gmra.mxu3 %v341_v1  ;;  %v505_v1 = vmax.f32 %v430_v29, 0.0 }
 0x15a   :  { %v1190_v2 = vpop.f32.mrf.mxu1 }
 0x15b   :  { %v445_v58 = vadd.f32 %v1237_v42, %v1190_v2 }
 0x162   :  { %v1194_v8 = vpop.f32.mrf.mxu1 }
 0x163   :  { %v448_v0 = vadd.f32 %v1237_v42, %v1194_v8 }
 0x165   :  { %486 = vmatmul.bf16.gmra.mxu3 %v342_v10  ;;  %v512_v26 = vmax.f32 %v448_v0, 0.0 }
 0x16a   :  { %v1202_v13 = vpop.f32.mrf.mxu1 }
 0x16b   :  { %v450_v2 = vadd.f32 %v1237_v42, %v1202_v13 }
 0x16d   :  { %v513_v29 = vmax.f32 %v450_v2, 0.0 }
 0x172   :  { %v1212_v22 = vpop.f32.mrf.mxu1 }
 0x173   :  { %v453_v8 = vadd.f32 %v1237_v42, %v1212_v22 }
 0x175   :  { %491 = vmatmul.bf16.gmra.mxu3 %v343_v24 }
 0x17a   :  { %v1220_v28 = vpop.f32.mrf.mxu1 }
 0x17b   :  { %v455_v13 = vadd.f32 %v1237_v42, %v1220_v28 }
 0x182   :  { %v1230_v37 = vpop.f32.mrf.mxu1 }
 0x183   :  { %v458_v22 = vadd.f32 %v1237_v42, %v1230_v37 }
 0x185   :  { %496 = vmatmul.bf16.gmra.mxu3 %v344_v38 }
 0x18a   :  { %v1232_v39 = vpop.f32.mrf.mxu1 }
 0x18b   :  { %v460_v28 = vadd.f32 %v1237_v42, %v1232_v39 }
 0x192   :  { %v462_v41 = vpop.f32.mrf.mxu1 }
 0x193   :  { %v463_v20 = vadd.f32 %v1237_v42, %v462_v41 }
 0x195   :  { %v518_v47 = vmax.f32 %v463_v20, 0.0 }
 0x197   :  { %v534_v53 = vsub.f32 %v518_v47, %v502_v50  ;;  %v511_v47 = vmax.f32 %v445_v58, 0.0 }
 0x19a   :  { %v464_v45 = vpop.f32.mrf.mxu1 }
 0x19b   :  { %v465_v48 = vadd.f32 %v1237_v42, %v464_v45  ;;  %v510_v45 = vmax.f32 %v443_v55, 0.0 }
 0x19d   :  { %v519_v52 = vmax.f32 %v465_v48, 0.0 }
 0x19f   :  { %v535_v54 = vsub.f32 %v519_v52, %v503_v51 }
 0x1a1   :  { %v550_v56 = vpack.c.bf16 %v535_v54, %v534_v53 }
 0x1a2   :  { %v467_v57 = vpop.f32.mrf.mxu1 }
 0x1a3   :  { %634 = vmatmul.bf16.vlgmr.msra.gmra.mxu2 %v550_v56  ;;  %v468_v59 = vadd.f32 %v1237_v42, %v467_v57 }
 0x1a5   :  { %v520_v61 = vmax.f32 %v468_v59, 0.0 }
 0x1a7   :  { %v536_v4 = vsub.f32 %v520_v61, %v504_v63 }
 0x1aa   :  { %v469_v60 = vpop.f32.mrf.mxu1 }
 0x1ab   :  { %v470_v62 = vadd.f32 %v1237_v42, %v469_v60 }
 0x1ad   :  { %v521_v3 = vmax.f32 %v470_v62, 0.0 }
 0x1af   :  { %v537_v5 = vsub.f32 %v521_v3, %v505_v1 }
 0x1b1   :  { %v551_v6 = vpack.c.bf16 %v537_v5, %v536_v4 }
 0x1b3   :  { %639 = vmatmul.bf16.gmra.mxu2 %v551_v6 }
 0x1b8   :  { %v472_v7 = vpop.f32.mrf.mxu3 }
 0x1b9   :  { %v473_v9 = vadd.f32 %v1237_v42, %v472_v7  ;;  %v514_v7 = vmax.f32 %v453_v8, 0.0 }
 0x1bb   :  { %v522_v11 = vmax.f32 %v473_v9, 0.0  ;;  %v515_v9 = vmax.f32 %v455_v13, 0.0 }
 0x1bd   :  { %v538_v17 = vsub.f32 %v522_v11, %v506_v14 }
 0x1c0   :  { %v474_v10 = vpop.f32.mrf.mxu3 }
 0x1c1   :  { %v475_v12 = vadd.f32 %v1237_v42, %v474_v10 }
 0x1c3   :  { %v523_v16 = vmax.f32 %v475_v12, 0.0 }
 0x1c5   :  { %v539_v18 = vsub.f32 %v523_v16, %v507_v15 }
 0x1c7   :  { %v552_v19 = vpack.c.bf16 %v539_v18, %v538_v17  ;;  %v516_v18 = vmax.f32 %v458_v22, 0.0 }
 0x1c8   :  { %v477_v21 = vpop.f32.mrf.mxu3 }
 0x1c9   :  { %644 = vmatmul.bf16.gmra.mxu2 %v552_v19  ;;  %v478_v23 = vadd.f32 %v1237_v42, %v477_v21  ;;  %v517_v19 = vmax.f32 %v460_v28, 0.0 }
 0x1cb   :  { %v524_v25 = vmax.f32 %v478_v23, 0.0 }
 0x1cd   :  { %v540_v33 = vsub.f32 %v524_v25, %v508_v30 }
 0x1d0   :  { %v479_v24 = vpop.f32.mrf.mxu3 }
 0x1d1   :  { %v480_v27 = vadd.f32 %v1237_v42, %v479_v24  ;;  %v1006_v24 = vld [vmem:[%s1299_s6] ss:$0 sm:$0xff] }
 0x1d3   :  { %v525_v32 = vmax.f32 %v480_v27, 0.0 }
 0x1d5   :  { %v541_v34 = vsub.f32 %v525_v32, %v509_v31 }
 0x1d7   :  { %v553_v35 = vpack.c.bf16 %v541_v34, %v540_v33 }
 0x1d8   :  { %v482_v38 = vpop.f32.mrf.mxu3 }
 0x1d9   :  { %649 = vmatmul.bf16.gmra.mxu2 %v553_v35  ;;  %v483_v41 = vadd.f32 %v1237_v42, %v482_v38 }
 0x1db   :  { %v526_v43 = vmax.f32 %v483_v41, 0.0 }
 0x1dd   :  { %v542_v50 = vsub.f32 %v526_v43, %v510_v45 }
 0x1e0   :  { %v484_v20 = vpop.f32.mrf.mxu3 }
 0x1e1   :  { %v485_v44 = vadd.f32 %v1237_v42, %v484_v20 }
 0x1e3   :  { %v527_v48 = vmax.f32 %v485_v44, 0.0 }
 0x1e5   :  { %v543_v51 = vsub.f32 %v527_v48, %v511_v47 }
 0x1e7   :  { %v554_v52 = vpack.c.bf16 %v543_v51, %v542_v50 }
 0x1e8   :  { %v487_v53 = vpop.f32.mrf.mxu3 }
 0x1e9   :  { %654 = vmatmul.bf16.gmra.mxu2 %v554_v52  ;;  %v488_v54 = vadd.f32 %v1237_v42, %v487_v53 }
 0x1eb   :  { %v528_v57 = vmax.f32 %v488_v54, 0.0 }
 0x1ed   :  { %v544_v61 = vsub.f32 %v528_v57, %v512_v26 }
 0x1f0   :  { %v489_v56 = vpop.f32.mrf.mxu3 }
 0x1f1   :  { %v490_v59 = vadd.f32 %v1237_v42, %v489_v56 }
 0x1f3   :  { %v529_v60 = vmax.f32 %v490_v59, 0.0 }
 0x1f5   :  { %v545_v62 = vsub.f32 %v529_v60, %v513_v29 }
 0x1f7   :  { %v555_v63 = vpack.c.bf16 %v545_v62, %v544_v61 }
 0x1f8   :  { %v492_v1 = vpop.f32.mrf.mxu3 }
 0x1f9   :  { %659 = vmatmul.bf16.gmra.mxu2 %v555_v63  ;;  %v493_v3 = vadd.f32 %v1237_v42, %v492_v1 }
 0x1fb   :  { %v530_v5 = vmax.f32 %v493_v3, 0.0 }
 0x1fd   :  { %v546_v40 = vsub.f32 %v530_v5, %v514_v7 }
 0x200   :  { %v494_v4 = vpop.f32.mrf.mxu3 }
 0x201   :  { %v495_v6 = vadd.f32 %v1237_v42, %v494_v4 }
 0x203   :  { %v531_v36 = vmax.f32 %v495_v6, 0.0 }
 0x205   :  { %v547_v10 = vsub.f32 %v531_v36, %v515_v9 }
 0x207   :  { %v556_v11 = vpack.c.bf16 %v547_v10, %v546_v40 }
 0x208   :  { %v497_v12 = vpop.f32.mrf.mxu3 }
 0x209   :  { %664 = vmatmul.bf16.gmra.mxu2 %v556_v11  ;;  %v498_v14 = vadd.f32 %v1237_v42, %v497_v12 }
 0x20b   :  { %v532_v16 = vmax.f32 %v498_v14, 0.0 }
 0x20d   :  { %v548_v23 = vsub.f32 %v532_v16, %v516_v18 }
 0x210   :  { %v499_v15 = vpop.f32.mrf.mxu3 }
 0x211   :  { %v500_v17 = vadd.f32 %v1237_v42, %v499_v15  ;;  %v739_v15 = vlaneseq }
 0x213   :  { %v533_v21 = vmax.f32 %v500_v17, 0.0  ;;  %v740_v18 = vand.u32 127, %v739_v15 }
 0x215   :  { %v549_v46 = vsub.f32 %v533_v21, %v517_v19  ;;  %v742_v21 = vadd.s32 4294967288, %v740_v18 }
 0x217   :  { %v557_v49 = vpack.c.bf16 %v549_v46, %v548_v23  ;;  %v746_v23 = vadd.s32 4294967280, %v740_v18  ;;  %v750_v46 = vadd.s32 4294967272, %v740_v18 }
 0x219   :  { %669 = vmatmul.bf16.gmra.mxu2 %v557_v49  ;;  %v754_v49 = vadd.s32 4294967264, %v740_v18 }
 0x226   :  { %v635_v25 = vpop.f32.mrf.mxu2 }
 0x227   :  { %v636_v37 = vadd.f32 %v1006_v24, %v635_v25 }
 0x229   :  { %v675_v27 = vand.u32 2147483647, %v636_v37 }
 0x22b   :  { %691 = vadd.xlane.f32.xlu0 %v675_v27 }
 0x22e   :  { %v637_v39 = vpop.f32.mrf.mxu2 }
 0x22f   :  { %v638_v30 = vadd.f32 %v1006_v24, %v637_v39  ;;  %v762_v39 = vadd.s32 4294967248, %v740_v18 }
 0x231   :  { %v676_v31 = vand.u32 2147483647, %v638_v30 }
 0x233   :  { %693 = vadd.xlane.f32.xlu0 %v676_v31 }
 0x236   :  { %v640_v42 = vpop.f32.mrf.mxu2 }
 0x237   :  { %v641_v32 = vadd.f32 %v1006_v24, %v640_v42 }
 0x239   :  { %v677_v33 = vand.u32 2147483647, %v641_v32  ;;  %v766_v32 = vadd.s32 4294967240, %v740_v18 }
 0x23b   :  { %695 = vadd.xlane.f32.xlu1 %v677_v33 }
 0x23e   :  { %v642_v34 = vpop.f32.mrf.mxu2 }
 0x23f   :  { %v643_v35 = vadd.f32 %v1006_v24, %v642_v34 }
 0x241   :  { %v678_v38 = vand.u32 2147483647, %v643_v35  ;;  %v770_v35 = vadd.s32 4294967232, %v740_v18 }
 0x243   :  { %697 = vadd.xlane.f32.xlu1 %v678_v38 }
 0x24c   :  { %v645_v41 = vpop.f32.mrf.mxu2 }
 0x24d   :  { %v646_v55 = vadd.f32 %v1006_v24, %v645_v41 }
 0x24f   :  { %v679_v58 = vand.u32 2147483647, %v646_v55  ;;  %v774_v55 = vadd.s32 4294967224, %v740_v18 }
 0x251   :  { %699 = vadd.xlane.f32.xlu2 %v679_v58 }
 0x254   :  { %v647_v20 = vpop.f32.mrf.mxu2 }
 0x255   :  { %v648_v43 = vadd.f32 %v1006_v24, %v647_v20 }
 0x257   :  { %v680_v44 = vand.u32 2147483647, %v648_v43  ;;  %v778_v43 = vadd.s32 4294967216, %v740_v18 }
 0x259   :  { %701 = vadd.xlane.f32.xlu2 %v680_v44 }
 0x25c   :  { %v650_v45 = vpop.f32.mrf.mxu2 }
 0x25d   :  { %v651_v47 = vadd.f32 %v1006_v24, %v650_v45 }
 0x25f   :  { %v681_v48 = vand.u32 2147483647, %v651_v47  ;;  %v782_v47 = vadd.s32 4294967208, %v740_v18 }
 0x261   :  { %703 = vadd.xlane.f32.xlu0 %v681_v48 }
 0x264   :  { %v652_v50 = vpop.f32.mrf.mxu2 }
 0x265   :  { %v653_v51 = vadd.f32 %v1006_v24, %v652_v50 }
 0x267   :  { %v682_v52 = vand.u32 2147483647, %v653_v51  ;;  %v786_v51 = vadd.s32 4294967200, %v740_v18 }
 0x269   :  { %705 = vadd.xlane.f32.xlu1 %v682_v52 }
 0x26c   :  { %v655_v53 = vpop.f32.mrf.mxu2 }
 0x26d   :  { %v656_v54 = vadd.f32 %v1006_v24, %v655_v53 }
 0x26f   :  { %v683_v0 = vand.u32 2147483647, %v656_v54 }
 0x271   :  { %707 = vadd.xlane.f32.xlu2 %v683_v0  ;;  %v790_v0 = vadd.s32 4294967192, %v740_v18 }
 0x274   :  { %v657_v2 = vpop.f32.mrf.mxu2 }
 0x275   :  { %v658_v56 = vadd.f32 %v1006_v24, %v657_v2 }
 0x277   :  { %v684_v57 = vand.u32 2147483647, %v658_v56 }
 0x279   :  { %709 = vadd.xlane.f32.xlu0 %v684_v57 }
 0x27c   :  { %v660_v59 = vpop.f32.mrf.mxu2 }
 0x27d   :  { %v661_v26 = vadd.f32 %v1006_v24, %v660_v59  ;;  %v794_v59 = vadd.s32 4294967184, %v740_v18 }
 0x27f   :  { %v685_v29 = vand.u32 2147483647, %v661_v26 }
 0x281   :  { %711 = vadd.xlane.f32.xlu1 %v685_v29 }
 0x284   :  { %v662_v60 = vpop.f32.mrf.mxu2 }
 0x285   :  { %v663_v61 = vadd.f32 %v1006_v24, %v662_v60 }
 0x287   :  { %v686_v62 = vand.u32 2147483647, %v663_v61 }
 0x289   :  { %713 = vadd.xlane.f32.xlu2 %v686_v62 }
 0x28c   :  { %v665_v63 = vpop.f32.mrf.mxu2 }
 0x28d   :  { %v666_v1 = vadd.f32 %v1006_v24, %v665_v63 }
 0x28f   :  { %v687_v3 = vand.u32 2147483647, %v666_v1 }
 0x291   :  { %715 = vadd.xlane.f32.xlu0 %v687_v3  ;;  %v798_v3 = vadd.s32 4294967176, %v740_v18 }
 0x294   :  { %v667_v8 = vpop.f32.mrf.mxu2 }
 0x295   :  { %v668_v13 = vadd.f32 %v1006_v24, %v667_v8 }
 0x297   :  { %v688_v4 = vand.u32 2147483647, %v668_v13 }
 0x299   :  { %717 = vadd.xlane.f32.xlu1 %v688_v4 }
 0x29c   :  { %v670_v5 = vpop.f32.mrf.mxu2 }
 0x29d   :  { %v671_v6 = vadd.f32 %v1006_v24, %v670_v5 }
 0x29e   :  { %v692_v10 = vpop.xlane.xlu0 %691 }
 0x29f   :  { %v689_v7 = vand.u32 2147483647, %v671_v6  ;;  %v741_v31 = vperm.slane %v692_v10, %v740_v18 }
 0x2a1   :  { %719 = vadd.xlane.f32.xlu2 %v689_v7 }
 0x2a4   :  { %v672_v9 = vpop.f32.mrf.mxu2 }
 0x2a5   :  { %v673_v36 = vadd.f32 %v1006_v24, %v672_v9  ;;  %v758_v24 = vadd.s32 4294967256, %v740_v18 }
 0x2a6   :  { %v694_v14 = vpop.xlane.xlu0 %693 }
 0x2a7   :  { %v690_v40 = vand.u32 2147483647, %v673_v36  ;;  %v743_v37 = vperm.slane %v694_v14, %v742_v21 }
 0x2a9   :  { %721 = vadd.xlane.f32.xlu0 %v690_v40  ;;  %v745_v38 = vsel %vm744_vm1, %v743_v37, %v741_v31 }
 0x2ae   :  { %v696_v11 = vpop.xlane.xlu1 %695 }
 0x2af   :  { %v747_v27 = vperm.slane %v696_v11, %v746_v23 }
 0x2b1   :  { %v749_v58 = vsel %vm748_vm2, %v747_v27, %v745_v38 }
 0x2b6   :  { %v698_v22 = vpop.xlane.xlu1 %697 }
 0x2b7   :  { %v751_v42 = vperm.slane %v698_v22, %v750_v46 }
 0x2b9   :  { %v753_v44 = vsel %vm752_vm3, %v751_v42, %v749_v58 }
 0x2c4   :  { %v700_v12 = vpop.xlane.xlu2 %699 }
 0x2c5   :  { %v755_v34 = vperm.slane %v700_v12, %v754_v49 }
 0x2c7   :  { %v757_v48 = vsel %vm756_vm4, %v755_v34, %v753_v44 }
 0x2cc   :  { %v702_v28 = vpop.xlane.xlu2 %701 }
 0x2cd   :  { %v759_v41 = vperm.slane %v702_v28, %v758_v24 }
 0x2cf   :  { %v761_v53 = vsel %vm760_vm5, %v759_v41, %v757_v48 }
 0x2d4   :  { %v704_v16 = vpop.xlane.xlu0 %703 }
 0x2d5   :  { %v763_v20 = vperm.slane %v704_v16, %v762_v39 }
 0x2d7   :  { %v765_v2 = vsel %vm764_vm6, %v763_v20, %v761_v53 }
 0x2dc   :  { %v706_v17 = vpop.xlane.xlu1 %705 }
 0x2dd   :  { %v767_v45 = vperm.slane %v706_v17, %v766_v32 }
 0x2df   :  { %v769_v26 = vsel %vm768_vm7, %v767_v45, %v765_v2 }
 0x2e4   :  { %v708_v19 = vpop.xlane.xlu2 %707 }
 0x2e5   :  { %v771_v50 = vperm.slane %v708_v19, %v770_v35 }
 0x2e7   :  { %v773_v61 = vsel %vm772_vm8, %v771_v50, %v769_v26 }
 0x2ec   :  { %v710_v25 = vpop.xlane.xlu0 %709 }
 0x2ed   :  { %v775_v54 = vperm.slane %v710_v25, %v774_v55 }
 0x2ef   :  { %v777_v63 = vsel %vm776_vm9, %v775_v54, %v773_v61 }
 0x2f4   :  { %v712_v30 = vpop.xlane.xlu1 %711 }
 0x2f5   :  { %v779_v56 = vperm.slane %v712_v30, %v778_v43 }
 0x2f7   :  { %v781_v8 = vsel %vm780_vm10, %v779_v56, %v777_v63 }
 0x2fc   :  { %v714_v33 = vpop.xlane.xlu2 %713 }
 0x2fd   :  { %v783_v29 = vperm.slane %v714_v33, %v782_v47 }
 0x2ff   :  { %v785_v4 = vsel %vm784_vm11, %v783_v29, %v781_v8 }
 0x304   :  { %v716_v52 = vpop.xlane.xlu0 %715 }
 0x305   :  { %v787_v62 = vperm.slane %v716_v52, %v786_v51 }
 0x307   :  { %v789_v5 = vsel %vm788_vm12, %v787_v62, %v785_v4 }
 0x30c   :  { %v718_v57 = vpop.xlane.xlu1 %717 }
 0x30d   :  { %v791_v1 = vperm.slane %v718_v57, %v790_v0 }
 0x30f   :  { %v793_v7 = vsel %vm792_vm13, %v791_v1, %v789_v5 }
 0x314   :  { %v720_v60 = vpop.xlane.xlu2 %719 }
 0x315   :  { %v795_v13 = vperm.slane %v720_v60, %v794_v59 }
 0x317   :  { %v797_v36 = vsel %vm796_vm14, %v795_v13, %v793_v7 }
 0x31c   :  { %v722_v6 = vpop.xlane.xlu0 %721 }
 0x31d   :  { %v799_v9 = vperm.slane %v722_v6, %v798_v3 }
 0x31f   :  { %v801_v40 = vsel %vm800_vm15, %v799_v9, %v797_v36 }
 0x320   :  { %803 = vst [vmem:[%s1300_s7] sm:$0x1] %v801_v40 }

</bundles_post_ra>
